<compile_context>
chip_gen: v6e
topology: v6e:2x2x1
jax: 0.10.0
libtpu: 0.0.40
codegen_flags: <defaults>
</compile_context>

<pallas_src>
import functools

import jax
import jax.numpy as jnp
from jax.experimental import pallas as pl
from jax.experimental.pallas import tpu as pltpu


# ----------------------------------------------------------------------------- kernel
def _upconv_kernel(x_ref, w_ref, shift_ref, o_ref):
    # x_ref:     (Cin, ts)   one batch image's spatial tile, NCHW-native (lanes = H*W)
    # w_ref:     (R, Cin)    R = 4*Cout rows ordered (co, di, dj); BN scale pre-folded
    # shift_ref: (R, 1)      folded BN/bias shift per output row
    # o_ref:     (R, ts)     lane-dense output tile
    acc = jnp.dot(w_ref[...], x_ref[...], preferred_element_type=jnp.float32)
    y = acc + shift_ref[...]
    o_ref[...] = jnp.where(y > 0, y, 0.2 * y).astype(o_ref.dtype)


# ----------------------------------------------------------------------------- tiling
def _pick_spatial_tile(HW, Cin, R, itemsize, budget_bytes=24 * 1024 * 1024):
    """Largest lane-dense (multiple of 128) spatial tile whose double-buffered
    VMEM working set stays under `budget_bytes` (conservative for v7x)."""
    hw128 = pl.cdiv(HW, 128) * 128
    fixed = 2 * (R * Cin + R) * itemsize          # weight + shift blocks (x2 buffers)
    per_col = 2 * (Cin + R) * itemsize            # x block + out block, per lane column
    max_ts = max(128, ((budget_bytes - fixed) // per_col) // 128 * 128)
    return int(min(2048, hw128, max_ts))


# ----------------------------------------------------------------------------- wrapper
@functools.partial(jax.jit, static_argnames=("eps",))
def upconv_block(x, weight, bias, gamma, beta, running_mean, running_var, eps=1e-5):
    """x: (B, Cin, H, W) NCHW.  Returns (B, Cout, 2H, 2W) NCHW."""
    B, Cin, H, W = x.shape
    Cin_w, Cout, kH, kW = weight.shape
    assert (Cin_w, kH, kW) == (Cin, 2, 2)
    R = 4 * Cout
    HW = H * W

    # --- fold BatchNorm (eval mode, running stats) + conv bias into the weights ------
    # TODO(synk): training-mode BatchNorm (batch statistics) not implemented; eval mode.
    bn_scale = gamma / jnp.sqrt(running_var + eps)                  # (Cout,)
    bn_shift = beta + bn_scale * (bias - running_mean)              # (Cout,)
    # rows ordered r = co*4 + di*2 + dj  (Cout outermost -> cheap depth-to-space later)
    w4 = jnp.transpose(weight, (1, 2, 3, 0)).reshape(R, Cin)        # (R, Cin)
    w4 = w4 * jnp.repeat(bn_scale, 4)[:, None]                      # BN scale folded in
    shift = jnp.repeat(bn_shift, 4).reshape(R, 1)                   # (R, 1)

    # --- consume x in native NCHW layout: (B, Cin, HW); lanes = spatial --------------
    x_flat = x.reshape(B, Cin, HW)                                  # free reshape
    itemsize = jnp.dtype(x.dtype).itemsize
    ts = _pick_spatial_tile(HW, Cin, R, itemsize)
    HW_pad = pl.cdiv(HW, ts) * ts
    if HW_pad != HW:
        x_flat = jnp.pad(x_flat, ((0, 0), (0, 0), (0, HW_pad - HW)))

    out_flat = pl.pallas_call(
        _upconv_kernel,
        out_shape=jax.ShapeDtypeStruct((B, R, HW_pad), x.dtype),
        grid_spec=pltpu.PrefetchScalarGridSpec(
            num_scalar_prefetch=0,
            grid=(B, HW_pad // ts),
            in_specs=[
                pl.BlockSpec((None, Cin, ts), lambda b, s: (b, 0, s)),
                # loop-invariant operands (constant index_map -> no re-DMA per step)
                pl.BlockSpec((R, Cin), lambda b, s: (0, 0)),
                pl.BlockSpec((R, 1), lambda b, s: (0, 0)),
            ],
            out_specs=pl.BlockSpec((None, R, ts), lambda b, s: (b, 0, s)),
        ),
        compiler_params=pltpu.CompilerParams(
            dimension_semantics=("parallel", "parallel")
        ),
    )(x_flat, w4, shift)

    # --- depth-to-space glue: (B, R, HW) -> (B, Cout, 2H, 2W) NCHW --------------------
    out = out_flat[:, :, :HW].reshape(B, Cout, 2, 2, H, W)   # (B, co, di, dj, H, W)
    out = jnp.transpose(out, (0, 1, 4, 2, 5, 3))             # (B, co, H, di, W, dj)
    return out.reshape(B, Cout, 2 * H, 2 * W)


# ----------------------------------------------------------------------------- reference
def upconv_block_ref(x, weight, bias, gamma, beta, running_mean, running_var, eps=1e-5):
    # y[b,co,2i+di,2j+dj] = sum_ci x[b,ci,i,j] * W[ci,co,di,dj] + bias[co]
    y = jnp.einsum("bchw,cokl->bohkwl", x, weight)
    B, Cout, H, _, W, _ = y.shape
    y = y.reshape(B, Cout, 2 * H, 2 * W) + bias[None, :, None, None]
    y = (y - running_mean[None, :, None, None]) / jnp.sqrt(running_var + eps)[None, :, None, None]
    y = y * gamma[None, :, None, None] + beta[None, :, None, None]
    return jnp.where(y > 0, y, 0.2 * y)


# ----------------------------------------------------------------------------- main
if __name__ == "__main__":
    B, Cin, Cout, H, W = 2, 4, 8, 16, 16

    key = jax.random.PRNGKey(0)
    kx, kw, kb, kg, kbe, km, kv = jax.random.split(key, 7)

    x = jax.random.normal(kx, (B, Cin, H, W), dtype=jnp.float32)
    # nn.ConvTranspose2d weight shape: (in_channels, out_channels, kH, kW)
    weight = jax.random.normal(kw, (Cin, Cout, 2, 2), dtype=jnp.float32) * 0.1
    bias = jax.random.normal(kb, (Cout,), dtype=jnp.float32) * 0.1
    # BatchNorm2d parameters / running stats (eval-mode semantics).
    gamma = 1.0 + 0.1 * jax.random.normal(kg, (Cout,), dtype=jnp.float32)
    beta = 0.1 * jax.random.normal(kbe, (Cout,), dtype=jnp.float32)
    running_mean = 0.1 * jax.random.normal(km, (Cout,), dtype=jnp.float32)
    running_var = 1.0 + 0.1 * jax.random.uniform(kv, (Cout,), dtype=jnp.float32)

    out = upconv_block(x, weight, bias, gamma, beta, running_mean, running_var)
    out = jax.block_until_ready(out)
    assert out.shape == (B, Cout, 2 * H, 2 * W), out.shape

    ref = upconv_block_ref(x, weight, bias, gamma, beta, running_mean, running_var)
    err = float(jnp.max(jnp.abs(out - ref)))
    assert jnp.allclose(out, ref, atol=1e-4, rtol=1e-4), err

    print("KERNEL_OK")
</pallas_src>

<mosaic_0001>
module attributes {stable_mosaic.version = 11 : i64} {
  func.func @_upconv_kernel(%arg0: i32, %arg1: i32, %arg2: memref<1x4x256xf32, #tpu.memory_space<vmem>>, %arg3: memref<32x4xf32, #tpu.memory_space<vmem>>, %arg4: memref<32x1xf32, #tpu.memory_space<vmem>>, %arg5: memref<1x32x256xf32, #tpu.memory_space<vmem>>) attributes {dimension_semantics = [#tpu.dimension_semantics<parallel>, #tpu.dimension_semantics<parallel>], iteration_bounds = array<i64: 2, 1>, scalar_prefetch = 0 : i64, scratch_operands = 0 : i64, tpu.core_type = #tpu.core_type<tc>, window_params = [{transform_indices = @transform_0, window_bounds = array<i64: 1, 4, 256>}, {pipeline_mode = #tpu.pipeline_mode<synchronous>, transform_indices = @transform_1, window_bounds = array<i64: 32, 4>}, {pipeline_mode = #tpu.pipeline_mode<synchronous>, transform_indices = @transform_2, window_bounds = array<i64: 32, 1>}, {transform_indices = @transform_3, window_bounds = array<i64: 1, 32, 256>}]} {
    %c0 = arith.constant 0 : index
    %c0_0 = arith.constant 0 : index
    %0 = vector.load %arg3[%c0, %c0_0] : memref<32x4xf32, #tpu.memory_space<vmem>>, vector<32x4xf32>
    %c0_1 = arith.constant 0 : index
    %c0_2 = arith.constant 0 : index
    %c0_3 = arith.constant 0 : index
    %1 = vector.load %arg2[%c0_1, %c0_2, %c0_3] : memref<1x4x256xf32, #tpu.memory_space<vmem>>, vector<1x4x256xf32>
    %2 = vector.shape_cast %1 : vector<1x4x256xf32> to vector<4x256xf32>
    %cst = arith.constant dense<0.000000e+00> : vector<32x256xf32>
    %3 = tpu.matmul %0, %2, %cst {dimension_numbers = #tpu.dot_dimension_numbers<[1], [0], [0], [1], [0, 0, 1, 1], [], []>} : vector<32x4xf32>, vector<4x256xf32>, vector<32x256xf32> -> vector<32x256xf32>
    %c0_4 = arith.constant 0 : index
    %c0_5 = arith.constant 0 : index
    %4 = vector.load %arg4[%c0_4, %c0_5] : memref<32x1xf32, #tpu.memory_space<vmem>>, vector<32x1xf32>
    %5 = vector.broadcast %4 : vector<32x1xf32> to vector<32x256xf32>
    %6 = arith.addf %3, %5 : vector<32x256xf32>
    %cst_6 = arith.constant 0.000000e+00 : f32
    %7 = vector.broadcast %cst_6 : f32 to vector<32x256xf32>
    %8 = arith.cmpf ogt, %6, %7 : vector<32x256xf32>
    %cst_7 = arith.constant 2.000000e-01 : f32
    %9 = vector.broadcast %cst_7 : f32 to vector<32x256xf32>
    %10 = arith.mulf %9, %6 : vector<32x256xf32>
    %11 = arith.select %8, %6, %10 : vector<32x256xi1>, vector<32x256xf32>
    %c0_8 = arith.constant 0 : index
    %c0_9 = arith.constant 0 : index
    %c0_10 = arith.constant 0 : index
    %12 = vector.load %arg5[%c0_8, %c0_9, %c0_10] : memref<1x32x256xf32, #tpu.memory_space<vmem>>, vector<1x32x256xf32>
    %13 = vector.shape_cast %12 : vector<1x32x256xf32> to vector<32x256xf32>
    %14 = vector.shape_cast %11 : vector<32x256xf32> to vector<1x32x256xf32>
    tpu.vector_store %arg5[%c0_8, %c0_9, %c0_10], %14 {strides = array<i32>} : memref<1x32x256xf32, #tpu.memory_space<vmem>>, vector<1x32x256xf32>,
    return
  }
  func.func @transform_0(%arg0: i32, %arg1: i32) -> (i32, i32, i32) {
    %c0_i32 = arith.constant 0 : i32
    %c0_i32_0 = arith.constant 0 : i32
    return %arg0, %c0_i32, %arg1 : i32, i32, i32
  }
  func.func @transform_1(%arg0: i32, %arg1: i32) -> (i32, i32) {
    %c0_i32 = arith.constant 0 : i32
    %c0_i32_0 = arith.constant 0 : i32
    %c0_i32_1 = arith.constant 0 : i32
    return %c0_i32, %c0_i32_0 : i32, i32
  }
  func.func @transform_2(%arg0: i32, %arg1: i32) -> (i32, i32) {
    %c0_i32 = arith.constant 0 : i32
    %c0_i32_0 = arith.constant 0 : i32
    %c0_i32_1 = arith.constant 0 : i32
    return %c0_i32, %c0_i32_0 : i32, i32
  }
  func.func @transform_3(%arg0: i32, %arg1: i32) -> (i32, i32, i32) {
    %c0_i32 = arith.constant 0 : i32
    %c0_i32_0 = arith.constant 0 : i32
    return %arg0, %c0_i32, %arg1 : i32, i32, i32
  }
}

</mosaic_0001>

<bundles_post_ra>
// kernel: mul.7
= control target key start
LH: loop header
LB: loop body
LE: loop exit
PB: predicated region body
PF: predicated region fallthrough
CT: control target
= control target key end

     0   :  { %s69_s10 = smov 28   ;;  %s70_s11 = smov 20   ;;  %vm3_vm0 = vcmask 31744   ;;  %vm9_vm1 = vcmask 261344   ;;  %vm15_vm2 = vcmask 228544   ;;  %vm21_vm3 = vcmask 195744   ;;  %s113_s0 = inlined_call_operand.vmem [shape: f32[8,4], index: 0, kind: input, shape index: {}]   ;;  %s114_s1 = inlined_call_operand.vmem [shape: f32[32], index: 1, kind: output, shape index: {}]  }
   0x1   :  { %v55_v0 = vld [vmem:[%s113_s0 + $0x7] sm:$0x1]   ;;  %v57_v1 = vld [vmem:[%s113_s0 + $0x5] sm:$0x1]   ;;  %v56_v2 = vld [vmem:[%s113_s0 + $0x6] sm:$0x1]  }
   0x2   :  { %7 = vrot.lane.b32.xlu0 %v55_v0, %s69_s10  ;;  %19 = vrot.lane.b32.xlu1 %v57_v1, %s70_s11  ;;  %v58_v3 = vld [vmem:[%s113_s0 + $0x4] sm:$0x1]   ;;  %v2_v4 = vld [vmem:[%s113_s0] sm:$0x1]   ;;  %s71_s18 = smov 24   ;;  %s72_s19 = smov 16  }
   0x3   :  { %4 = vst.msk [vmem:[#allocation0] sm:$0x1] %vm3_vm0, %v2_v4   ;;  %v59_v5 = vld [vmem:[%s113_s0 + $0x3] sm:$0x1]   ;;  %v60_v6 = vld [vmem:[%s113_s0 + $0x2] sm:$0x1]  }
   0x4   :  { %s73_s24 = smov 12   ;;  %s74_s25 = smov 8   ;;  %v61_v7 = vld [vmem:[%s113_s0 + $0x1] sm:$0x1]   ;;  %vm27_vm4 = vcmask 162944   ;;  %vm33_vm5 = vcmask 130144  }
   0x5   :  { %s75_s0 = smov 4   ;;  %vm39_vm6 = vcmask 97344   ;;  %vm45_vm7 = vcmask 64544  }
   0x6   :  { %13 = vrot.lane.b32.xlu0 %v56_v2, %s71_s18  ;;  %25 = vrot.lane.b32.xlu1 %v58_v3, %s72_s19 }
   0xa   :  { %31 = vrot.lane.b32.xlu0 %v59_v5, %s73_s24  ;;  %37 = vrot.lane.b32.xlu1 %v60_v6, %s74_s25 }
   0xe   :  { %43 = vrot.lane.b32.xlu0 %v61_v7, %s75_s0 }
  0x74   :  { %v8_v8 = vpop.permute.xlu0 %7   ;;  %v20_v9 = vpop.permute.xlu1 %19  }
  0x75   :  { %10 = vst.msk [vmem:[#allocation0] sm:$0x1] %vm9_vm1, %v8_v8  }
  0x78   :  { %v14_v10 = vpop.permute.xlu0 %13   ;;  %v26_v11 = vpop.permute.xlu1 %25  }
  0x79   :  { %16 = vst.msk [vmem:[#allocation0] sm:$0x1] %vm15_vm2, %v14_v10  }
  0x7a   :  { %22 = vst.msk [vmem:[#allocation0] sm:$0x1] %vm21_vm3, %v20_v9  }
  0x7b   :  { %28 = vst.msk [vmem:[#allocation0] sm:$0x1] %vm27_vm4, %v26_v11  }
  0x7c   :  { %v32_v12 = vpop.permute.xlu0 %31   ;;  %v38_v13 = vpop.permute.xlu1 %37  }
  0x7d   :  { %34 = vst.msk [vmem:[#allocation0] sm:$0x1] %vm33_vm5, %v32_v12  }
  0x7e   :  { %40 = vst.msk [vmem:[#allocation0] sm:$0x1] %vm39_vm6, %v38_v13  }
  0x80   :  { %v44_v14 = vpop.permute.xlu0 %43  }
  0x81   :  { %46 = vst.msk [vmem:[#allocation0] sm:$0x1] %vm45_vm7, %v44_v14  }
  0x88   :  { %v51_v15 = vld [vmem:[#allocation0] sm:$0x1] }
  0x89   :  { %54 = vst [vmem:[%s114_s1] sm:$0x1] %v51_v15 }

// kernel: upconv_block.1
= control target key start
LH: loop header
LB: loop body
LE: loop exit
PB: predicated region body
PF: predicated region fallthrough
CT: control target
= control target key end

     0   :  { %s563_s12 = smov 0   ;;  %s565_s13 = smov 0   ;;  %s634_s0 = inlined_call_operand.vmem [shape: f32[2,4,256], index: 0, kind: input, shape index: {}]   ;;  %s635_s1 = inlined_call_operand.vmem [shape: f32[32,4], index: 1, kind: input, shape index: {}]   ;;  %s636_s2 = inlined_call_operand.vmem [shape: f32[32,1], index: 2, kind: input, shape index: {}]   ;;  %s637_s3 = inlined_call_operand.vmem [shape: f32[2,32,256], index: 3, kind: output, shape index: {}]  }
   0x1   :  { %s567_s14 = smov 0  }
   0x2 LB: > { %s25_s15 = sadd.s32 1, %s535_s13  ;;  %p471_p0 = scmp.ge.s32.totalorder %s539_s14, 1  ;;  %s539_s14 = sphi %s567_s14, %s13_s14   ;;  %s535_s13 = sphi %s565_s13, %s639_s13   ;;  %s531_s12 = sphi %s563_s12, %s638_s12  }
   0x3   : > { %p27_p1 = scmp.ge.s32.totalorder %s25_s15, 2  ;;  %p158_p2 = scmp.lt.s32.totalorder %s539_s14, 3 }
   0x5   : > { %s641_s15 = smov (%p27_p1, %s25_s15), 0  ;;  %p159_p3 = pnand %p471_p0, %p158_p2 }
   0x6   : > { %p191_p4 = scmp.lt.s32.totalorder (!%p159_p3), %s531_s12, 1 }
   0x7   : > { %162 = sbr.rel (%p159_p3) target bundleno = 228 (0xe4), region = 32 }
   0xc   : > { %v541_v0 = vmov 0.0   ;;  %v217_v1 = vld [vmem:[%s636_s2 + $0x10] sm:$0xff]  ;;  %s643_s12 = smov (!%p191_p4, %s531_s12), 1  ;;  %v542_v2 = vmov 0   ;;  %v215_v3 = vld [vmem:[%s636_s2] sm:$0xff]  ;;  %v218_v4 = vld [vmem:[%s636_s2 + $0x18] sm:$0xff] }
   0xd   : > { %323 = vmatprep.mubr.f32.mxu0 %v541_v0  ;;  %335 = vmatprep.mubr.f32.mxu1 %v541_v0  ;;  %s484_s20 = sshll.u32 %s643_s12, 3  ;;  %v216_v5 = vld [vmem:[%s636_s2 + $0x8] sm:$0xff]  ;;  %vm254_vm0 = vcmask 1043456   ;;  %v210_v8 = vld [vmem:[%s635_s1] sm:$0xff]  ;;  %vm241_vm1 = vcmask 31744   ;;  %v212_v9 = vld [vmem:[%s635_s1 + $0x10] sm:$0xff] }
   0xe   : > { %515 = vset.pattern.permute.xlu1 %v542_v2  ;;  %514 = vset.pattern.permute.xlu0 %v542_v2  ;;  %s198_s27 = scalar_lea.vmem %s634_s0, %s484_s20  ;;  %v211_v10 = vld [vmem:[%s635_s1 + $0x8] sm:$0xff]  ;;  %v213_v11 = vld [vmem:[%s635_s1 + $0x18] sm:$0xff]  ;;  %s485_s9 = sshll.u32 %s643_s12, 6 }
   0xf   : > { %231 = vperm.xlu1 %515, %v217_v1   ;;  %221 = vperm.xlu0 %514, %v215_v3   ;;  %v214_v6 = vld [vmem:[%s198_s27] sm:$0xff]  ;;  %s615_s16 = scalar_lea.vmem %s637_s3, %s485_s9 }
  0x10   : > { %v240_v7 = vcombine.high %v214_v6, %v214_v6 }
  0x12   : > { %476 = vmatprep.subr.msk.mxu0 %vm254_vm0, %v240_v7  ;;  %486 = vmatprep.subr.msk.mxu1 %vm254_vm0, %v240_v7 }
  0x13   : > { %236 = vperm.xlu1 %515, %v218_v4   ;;  %226 = vperm.xlu0 %514, %v216_v5  }
  0x14   : > { %477 = vmatpush1.msk.msra.mxu0 %vm254_vm0, %v214_v6  ;;  %487 = vmatpush1.msk.msra.mxu1 %vm254_vm0, %v214_v6 }
  0x15   : > { %478 = vmatmul.mubr.msk.f32.vlgmr.msra.gmra.mxu0 %vm241_vm1, %v210_v8  ;;  %480 = vmatmul.mubr.msk.f32.vlgmr.msra.gmra.mxu1 %vm241_vm1, %v212_v9 }
  0x16   : > { %329 = vmatprep.mubr.f32.mxu0 %v541_v0  ;;  %341 = vmatprep.mubr.f32.mxu1 %v541_v0 }
  0x19   : > { %479 = vmatmul.mubr.msk.f32.gmra.mxu0 %vm241_vm1, %v211_v10  ;;  %481 = vmatmul.mubr.msk.f32.gmra.mxu1 %vm241_vm1, %v213_v11 }
  0x8a   : > { %v232_v12 = vpop.permute.xlu1 %231  ;;  %v222_v13 = vpop.permute.xlu0 %221 }
  0x8e   : > { %v237_v22 = vpop.permute.xlu1 %236  ;;  %v227_v23 = vpop.permute.xlu0 %226 }
  0xd5   : > { %v325_v14 = vpop.f32.mrf.mxu0  ;;  %v337_v15 = vpop.f32.mrf.mxu1 }
  0xd6   : > { %v326_v16 = vadd.f32 %v325_v14, %v222_v13  ;;  %v338_v17 = vadd.f32 %v337_v15, %v232_v12 }
  0xd7   : > { %v327_v18 = vpop.f32.mrf.mxu0  ;;  %v339_v19 = vpop.f32.mrf.mxu1 }
  0xd8   : > { %vm348_vm2 = vcmp.gt.f32.partialorder %v326_v16, 0.0  ;;  %v356_v20 = vmul.f32 0.2, %v326_v16  ;;  %vm352_vm3 = vcmp.gt.f32.partialorder %v338_v17, 0.0  ;;  %v360_v21 = vmul.f32 0.2, %v338_v17 }
  0xd9   : > { %v328_v24 = vadd.f32 %v327_v18, %v222_v13  ;;  %v340_v25 = vadd.f32 %v339_v19, %v232_v12  ;;  %v331_v26 = vpop.f32.mrf.mxu0  ;;  %v343_v27 = vpop.f32.mrf.mxu1 }
  0xda   : > { %v364_v28 = vsel %vm348_vm2, %v326_v16, %v356_v20  ;;  %v368_v29 = vsel %vm352_vm3, %v338_v17, %v360_v21  ;;  %v332_v30 = vadd.f32 %v331_v26, %v227_v23  ;;  %v344_v31 = vadd.f32 %v343_v27, %v237_v22 }
  0xdb   : > { %372 = vst [vmem:[%s615_s16] sm:$0xff] %v364_v28  ;;  %376 = vst [vmem:[%s615_s16 + $0x20] sm:$0xff] %v368_v29  ;;  %vm349_vm4 = vcmp.gt.f32.partialorder %v328_v24, 0.0  ;;  %v357_v32 = vmul.f32 0.2, %v328_v24  ;;  %vm353_vm5 = vcmp.gt.f32.partialorder %v340_v25, 0.0  ;;  %v333_v34 = vpop.f32.mrf.mxu0  ;;  %v345_v35 = vpop.f32.mrf.mxu1 }
  0xdc   : > { %v361_v33 = vmul.f32 0.2, %v340_v25  ;;  %vm350_vm6 = vcmp.gt.f32.partialorder %v332_v30, 0.0  ;;  %v358_v36 = vmul.f32 0.2, %v332_v30  ;;  %vm354_vm7 = vcmp.gt.f32.partialorder %v344_v31, 0.0 }
  0xdd   : > { %v362_v37 = vmul.f32 0.2, %v344_v31  ;;  %v365_v38 = vsel %vm349_vm4, %v328_v24, %v357_v32  ;;  %v334_v40 = vadd.f32 %v333_v34, %v227_v23  ;;  %v346_v41 = vadd.f32 %v345_v35, %v237_v22 }
  0xde   : > { %v369_v39 = vsel %vm353_vm5, %v340_v25, %v361_v33  ;;  %373 = vst [vmem:[%s615_s16 + $0x8] sm:$0xff] %v365_v38  ;;  %v366_v42 = vsel %vm350_vm6, %v332_v30, %v358_v36 }
  0xdf   : > { %377 = vst [vmem:[%s615_s16 + $0x28] sm:$0xff] %v369_v39  ;;  %v370_v43 = vsel %vm354_vm7, %v344_v31, %v362_v37  ;;  %374 = vst [vmem:[%s615_s16 + $0x10] sm:$0xff] %v366_v42  ;;  %vm351_vm8 = vcmp.gt.f32.partialorder %v334_v40, 0.0  ;;  %v359_v44 = vmul.f32 0.2, %v334_v40  ;;  %vm355_vm9 = vcmp.gt.f32.partialorder %v346_v41, 0.0 }
  0xe0   : > { %378 = vst [vmem:[%s615_s16 + $0x30] sm:$0xff] %v370_v43  ;;  %v363_v45 = vmul.f32 0.2, %v346_v41 }
  0xe1   : > { %v367_v46 = vsel %vm351_vm8, %v334_v40, %v359_v44 }
  0xe2   : > { %v371_v47 = vsel %vm355_vm9, %v346_v41, %v363_v45  ;;  %375 = vst [vmem:[%s615_s16 + $0x18] sm:$0xff] %v367_v46 }
  0xe3   : > { %379 = vst [vmem:[%s615_s16 + $0x38] sm:$0xff] %v371_v47 }
  0xe4 PF: > { %s13_s14 = sadd.s32 1, %s539_s14   ;;  %s638_s12 = smov %s535_s13 }
  0xe5   : > { %p10_p5 = scmp.ge.s32.totalorder %s13_s14, 4   ;;  %s639_s13 = smov %s641_s15 }
  0xe7   :  { %12 = sbr.rel (!%p10_p5) target bundleno = 2 (0x2), region = 62 }

</bundles_post_ra>
